<compile_context>
chip_gen: v5e
topology: v5e:2x2
jax: 0.10.0
libtpu: 0.0.40
codegen_flags: <defaults>
</compile_context>

<pallas_src>
import functools

import jax
import jax.numpy as jnp
import numpy as np
from jax.experimental import pallas as pl
from jax.experimental.pallas import tpu as pltpu


# ----------------------------- fused Pallas kernel -----------------------------

def _gat_fused_kernel(h_ref, w_gat_ref, al_rows_ref, ar_cols_ref, b_gat_ref,
                      adj_ref, w_fc_ref, b_fc_ref, o_ref, act_ref, *,
                      num_heads, hid, approx_recip=True):
    f32 = jnp.float32
    bf16 = jnp.bfloat16
    adj = adj_ref[...]                        # (N_dst, N_src) f32 {0,1}
    n_dst = adj.shape[0]
    neg = f32(-1e30)

    # (1) projection for all heads in one MXU pass, bf16 operands, f32 accum:
    #     (N_src, in) @ (in, H*hid)
    feat = jnp.dot(h_ref[...], w_gat_ref[...], preferred_element_type=f32)
    feat_bf = feat.astype(bf16)               # bf16 copy feeds later MXU ops

    # (2) attention logits for all heads (tiny operands -> keep f32).
    #     al_rows is (H, H*hid) block-structured -> el_all[h, u] = <a_l^h, feat^h_u>
    #     ar_cols is (H*hid, H) block-structured -> er_all[v, h] = <a_r^h, feat^h_v>
    # TODO(synk): at realistic N_src, verify this dot_general does not
    # materialize feat^T; if it does, switch to feat @ [a_l|a_r] (one push)
    # and transpose only the tiny (N_src, H) el result.
    el_all = jax.lax.dot_general(al_rows_ref[...], feat,
                                 (((1,), (1,)), ((), ())),
                                 preferred_element_type=f32)        # (H, N_src)
    er_all = jnp.dot(feat[:n_dst], ar_cols_ref[...],
                     preferred_element_type=f32)                    # (N_dst, H)

    b_gat = b_gat_ref[...]                                          # (1, H*hid)

    for h in range(num_heads):                                      # static unroll
        # e[v, u] = LeakyReLU(el[u] + er[v], 0.2), masked on non-edges
        e = er_all[:, h:h + 1] + el_all[h:h + 1, :]                 # (N_dst, N_src)
        e = jnp.where(e > 0, e, 0.2 * e)
        e = jnp.where(adj > 0, e, neg)

        # edge_softmax; re-mask after exp so zero-in-degree rows aggregate 0
        e = e - jnp.max(e, axis=-1, keepdims=True)
        p = jnp.exp(e) * adj
        denom = jnp.maximum(jnp.sum(p, axis=-1, keepdims=True), f32(1e-30))
        if approx_recip:
            inv = pl.reciprocal(denom, approx=True)                 # EUP recip
        else:
            inv = 1.0 / denom

        # message aggregation on this head's lane slab (bf16 MXU operands),
        # softmax normalization deferred to the (N_dst, hid) aggregate.
        feat_h = feat_bf[:, h * hid:(h + 1) * hid]                  # (N_src, hid)
        rst = jnp.dot(p.astype(bf16), feat_h,
                      preferred_element_type=f32)                   # (N_dst, hid)
        rst = rst * inv
        rst = jnp.maximum(rst + b_gat[:, h * hid:(h + 1) * hid], 0.0)  # bias+ReLU

        # .flatten(1): write this head's slab into the VMEM activation scratch
        act_ref[:, h * hid:(h + 1) * hid] = rst

    # (3) fc (output padded to a 128-lane slab) + h / ||h||_F.
    #     Padded w_fc/b_fc columns are exactly 0, so sq is the true norm.
    y = jnp.dot(act_ref[...].astype(bf16), w_fc_ref[...],
                preferred_element_type=f32) + b_fc_ref[...]
    sq = jnp.sum(y * y, axis=1, keepdims=True)
    sq = jnp.sum(sq, axis=0, keepdims=True)                         # (1, 1)
    o_ref[...] = y * jax.lax.rsqrt(sq)


def gat_forward(params, input_nodes, adj):
    # TODO(synk): only the num_layers == 1 path is implemented; the PyTorch
    # __init__ for l >= 1 references undefined names (num_hidden, heads).
    num_heads, hid = params["attn_l"].shape
    n_dst, n_src = adj.shape
    in_dim = params["emb"].shape[1]
    out_dim = params["w_fc"].shape[1]
    out_pad = ((out_dim + 127) // 128) * 128          # lane-dense output width

    # embedding lookup (gather) — glue in plain JAX; cast to bf16 for the MXU
    h = jnp.take(params["emb"], input_nodes, axis=0).astype(jnp.bfloat16)
    w_gat = params["w_gat"].astype(jnp.bfloat16)

    # zero-pad fc to a multiple-of-128-lane output; slice the pad off outside
    w_fc = jnp.pad(params["w_fc"],
                   ((0, 0), (0, out_pad - out_dim))).astype(jnp.bfloat16)
    b_fc = jnp.pad(params["b_fc"], ((0, 0), (0, out_pad - out_dim)))

    flops = (2 * n_src * in_dim * num_heads * hid            # projection
             + 2 * n_src * num_heads * hid * num_heads       # el
             + 2 * n_dst * num_heads * hid * num_heads       # er
             + 2 * num_heads * n_dst * n_src * hid           # aggregation
             + 2 * n_dst * num_heads * hid * out_pad)        # fc
    transcendentals = num_heads * n_dst * (n_src + 1)        # exp + recip
    bytes_accessed = (h.size * 2 + w_gat.size * 2
                      + params["attn_l_rows"].size * 4
                      + params["attn_r_cols"].size * 4
                      + params["b_gat"].size * 4
                      + adj.size * 4
                      + w_fc.size * 2 + b_fc.size * 4
                      + n_dst * out_pad * 4)

    kernel = functools.partial(_gat_fused_kernel, num_heads=num_heads, hid=hid)
    y = pl.pallas_call(
        kernel,
        out_shape=jax.ShapeDtypeStruct((n_dst, out_pad), jnp.float32),
        scratch_shapes=[pltpu.VMEM((n_dst, num_heads * hid), jnp.float32)],
        compiler_params=pltpu.CompilerParams(
            vmem_limit_bytes=32 * 1024 * 1024),
        cost_estimate=pl.CostEstimate(flops=flops,
                                      transcendentals=transcendentals,
                                      bytes_accessed=bytes_accessed),
    )(h, w_gat, params["attn_l_rows"], params["attn_r_cols"],
      params["b_gat"], adj, w_fc, b_fc)
    return y[:, :out_dim]


# ------------------------------ params / reference ------------------------------

def init_params(key, num_nodes, in_dim, hidden_dim, num_heads):
    ks = jax.random.split(key, 7)
    s = 0.1
    attn_l = s * jax.random.normal(ks[2], (num_heads, hidden_dim), jnp.float32)
    attn_r = s * jax.random.normal(ks[3], (num_heads, hidden_dim), jnp.float32)

    # Block-structured attention operands so the kernel computes el / er for
    # ALL heads with a single MXU push each (built once, tiny).
    eye = jnp.eye(num_heads, dtype=jnp.float32)
    al_rows = (eye[:, :, None] * attn_l[None, :, :]).reshape(
        num_heads, num_heads * hidden_dim)                          # (H, H*hid)
    ar_rows = (eye[:, :, None] * attn_r[None, :, :]).reshape(
        num_heads, num_heads * hidden_dim)
    return {
        "emb":    s * jax.random.normal(ks[0], (num_nodes, in_dim), jnp.float32),
        "w_gat":  s * jax.random.normal(ks[1], (in_dim, num_heads * hidden_dim),
                                        jnp.float32),
        "attn_l": attn_l,
        "attn_r": attn_r,
        "attn_l_rows": al_rows,                                     # (H, H*hid)
        "attn_r_cols": ar_rows.T,                                   # (H*hid, H)
        "b_gat":  s * jax.random.normal(ks[4], (1, num_heads * hidden_dim),
                                        jnp.float32),
        "w_fc":   s * jax.random.normal(ks[5], (num_heads * hidden_dim, hidden_dim),
                                        jnp.float32),
        "b_fc":   s * jax.random.normal(ks[6], (1, hidden_dim), jnp.float32),
    }


def gat_reference(params, input_nodes, adj):
    num_heads, hid = params["attn_l"].shape
    n_dst = adj.shape[0]
    h = jnp.take(params["emb"], input_nodes, axis=0)
    f = (h @ params["w_gat"]).reshape(h.shape[0], num_heads, hid)
    el = jnp.sum(f * params["attn_l"][None], axis=-1)               # (N_src, H)
    er = jnp.sum(f[:n_dst] * params["attn_r"][None], axis=-1)       # (N_dst, H)
    e = er[:, None, :] + el[None, :, :]                             # (N_dst, N_src, H)
    e = jnp.where(e > 0, e, 0.2 * e)
    e = jnp.where(adj[:, :, None] > 0, e, -1e30)
    e = e - jnp.max(e, axis=1, keepdims=True)
    p = jnp.exp(e) * adj[:, :, None]
    alpha = p / jnp.maximum(jnp.sum(p, axis=1, keepdims=True), 1e-30)
    rst = jnp.einsum("vuh,uhd->vhd", alpha, f)
    b = params["b_gat"].reshape(num_heads, hid)
    rst = jax.nn.relu(rst + b[None])
    y = rst.reshape(n_dst, num_heads * hid) @ params["w_fc"] + params["b_fc"]
    return y / jnp.linalg.norm(y)


# ------------------------------------ main ------------------------------------

if __name__ == "__main__":
    num_nodes, in_dim, hidden_dim, num_heads = 64, 32, 32, 4
    n_src, n_dst = 16, 8

    key = jax.random.PRNGKey(0)
    k_param, k_nodes, k_adj = jax.random.split(key, 3)

    params = init_params(k_param, num_nodes, in_dim, hidden_dim, num_heads)

    input_nodes = jax.random.randint(k_nodes, (n_src,), 0, num_nodes, jnp.int32)

    # dense block adjacency (dst x src); mostly >=1 edge per dst, but make the
    # last dst node zero-in-degree to exercise the allow_zero_in_degree path.
    adj = jax.random.bernoulli(k_adj, 0.3, (n_dst, n_src)).astype(jnp.float32)
    adj = adj.at[jnp.arange(n_dst), jnp.arange(n_dst)].set(1.0)
    adj = adj.at[n_dst - 1, :].set(0.0)

    out = gat_forward(params, input_nodes, adj)
    out = jax.block_until_ready(out)

    ref = jax.block_until_ready(gat_reference(params, input_nodes, adj))
    assert out.shape == (n_dst, hidden_dim)
    # bf16 MXU operands (f32 accumulation) -> slightly looser tolerance
    np.testing.assert_allclose(np.asarray(out), np.asarray(ref),
                               rtol=5e-2, atol=2e-3)
    print("KERNEL_OK")
</pallas_src>

<mosaic_0001>
module attributes {stable_mosaic.version = 11 : i64} {
  func.func @_gat_fused_kernel(%arg0: memref<16x32xbf16, #tpu.memory_space<vmem>>, %arg1: memref<32x128xbf16, #tpu.memory_space<vmem>>, %arg2: memref<4x128xf32, #tpu.memory_space<vmem>>, %arg3: memref<128x4xf32, #tpu.memory_space<vmem>>, %arg4: memref<1x128xf32, #tpu.memory_space<vmem>>, %arg5: memref<8x16xf32, #tpu.memory_space<vmem>>, %arg6: memref<128x128xbf16, #tpu.memory_space<vmem>>, %arg7: memref<1x128xf32, #tpu.memory_space<vmem>>, %arg8: memref<8x128xf32, #tpu.memory_space<vmem>>, %arg9: memref<8x128xf32, #tpu.memory_space<vmem>>) attributes {dimension_semantics = [], scalar_prefetch = 0 : i64, scratch_operands = 1 : i64, tpu.core_type = #tpu.core_type<tc>} {
    %c0 = arith.constant 0 : index
    %c0_0 = arith.constant 0 : index
    %0 = vector.load %arg5[%c0, %c0_0] : memref<8x16xf32, #tpu.memory_space<vmem>>, vector<8x16xf32>
    %c0_1 = arith.constant 0 : index
    %c0_2 = arith.constant 0 : index
    %1 = vector.load %arg0[%c0_1, %c0_2] : memref<16x32xbf16, #tpu.memory_space<vmem>>, vector<16x32xbf16>
    %c0_3 = arith.constant 0 : index
    %c0_4 = arith.constant 0 : index
    %2 = vector.load %arg1[%c0_3, %c0_4] : memref<32x128xbf16, #tpu.memory_space<vmem>>, vector<32x128xbf16>
    %cst = arith.constant dense<0.000000e+00> : vector<16x128xf32>
    %3 = tpu.matmul %1, %2, %cst {dimension_numbers = #tpu.dot_dimension_numbers<[1], [0], [0], [1], [0, 0, 1, 1], [], []>} : vector<16x32xbf16>, vector<32x128xbf16>, vector<16x128xf32> -> vector<16x128xf32>
    %4 = arith.truncf %3 : vector<16x128xf32> to vector<16x128xbf16>
    %c0_5 = arith.constant 0 : index
    %c0_6 = arith.constant 0 : index
    %5 = vector.load %arg2[%c0_5, %c0_6] : memref<4x128xf32, #tpu.memory_space<vmem>>, vector<4x128xf32>
    %cst_7 = arith.constant dense<0.000000e+00> : vector<4x16xf32>
    %6 = tpu.matmul %5, %3, %cst_7 {dimension_numbers = #tpu.dot_dimension_numbers<[1], [1], [0], [0], [0, 0, 1, 0], [], []>} : vector<4x128xf32>, vector<16x128xf32>, vector<4x16xf32> -> vector<4x16xf32>
    %7 = vector.extract_strided_slice %3 {offsets = [0, 0], sizes = [8, 128], strides = [1, 1]} : vector<16x128xf32> to vector<8x128xf32>
    %c0_8 = arith.constant 0 : index
    %c0_9 = arith.constant 0 : index
    %8 = vector.load %arg3[%c0_8, %c0_9] : memref<128x4xf32, #tpu.memory_space<vmem>>, vector<128x4xf32>
    %cst_10 = arith.constant dense<0.000000e+00> : vector<8x4xf32>
    %9 = tpu.matmul %7, %8, %cst_10 {dimension_numbers = #tpu.dot_dimension_numbers<[1], [0], [0], [1], [0, 0, 1, 1], [], []>} : vector<8x128xf32>, vector<128x4xf32>, vector<8x4xf32> -> vector<8x4xf32>
    %c0_11 = arith.constant 0 : index
    %c0_12 = arith.constant 0 : index
    %10 = vector.load %arg4[%c0_11, %c0_12] : memref<1x128xf32, #tpu.memory_space<vmem>>, vector<1x128xf32>
    %11 = vector.extract_strided_slice %9 {offsets = [0, 0], sizes = [8, 1], strides = [1, 1]} : vector<8x4xf32> to vector<8x1xf32>
    %12 = vector.extract_strided_slice %6 {offsets = [0, 0], sizes = [1, 16], strides = [1, 1]} : vector<4x16xf32> to vector<1x16xf32>
    %13 = vector.broadcast %11 : vector<8x1xf32> to vector<8x16xf32>
    %14 = vector.broadcast %12 : vector<1x16xf32> to vector<8x16xf32>
    %15 = arith.addf %13, %14 : vector<8x16xf32>
    %cst_13 = arith.constant 0.000000e+00 : f32
    %16 = vector.broadcast %cst_13 : f32 to vector<8x16xf32>
    %17 = arith.cmpf ogt, %15, %16 : vector<8x16xf32>
    %cst_14 = arith.constant 2.000000e-01 : f32
    %18 = vector.broadcast %cst_14 : f32 to vector<8x16xf32>
    %19 = arith.mulf %18, %15 : vector<8x16xf32>
    %20 = arith.select %17, %15, %19 : vector<8x16xi1>, vector<8x16xf32>
    %cst_15 = arith.constant 0.000000e+00 : f32
    %21 = vector.broadcast %cst_15 : f32 to vector<8x16xf32>
    %22 = arith.cmpf ogt, %0, %21 : vector<8x16xf32>
    %cst_16 = arith.constant -1.000000e+30 : f32
    %23 = vector.broadcast %cst_16 : f32 to vector<8x16xf32>
    %24 = arith.select %22, %20, %23 : vector<8x16xi1>, vector<8x16xf32>
    %cst_17 = arith.constant dense<0xFF800000> : vector<8xf32>
    %25 = vector.multi_reduction <maximumf>, %24, %cst_17 [1] : vector<8x16xf32> to vector<8xf32>
    %26 = vector.shape_cast %25 : vector<8xf32> to vector<8x1xf32>
    %27 = vector.broadcast %26 : vector<8x1xf32> to vector<8x16xf32>
    %28 = arith.subf %24, %27 : vector<8x16xf32>
    %29 = math.exp %28 : vector<8x16xf32>
    %30 = arith.mulf %29, %0 : vector<8x16xf32>
    %cst_18 = arith.constant dense<0.000000e+00> : vector<8xf32>
    %31 = vector.multi_reduction <add>, %30, %cst_18 [1] : vector<8x16xf32> to vector<8xf32>
    %32 = vector.shape_cast %31 : vector<8xf32> to vector<8x1xf32>
    %cst_19 = arith.constant 1.000000e-30 : f32
    %33 = vector.broadcast %cst_19 : f32 to vector<8x1xf32>
    %34 = arith.maximumf %32, %33 : vector<8x1xf32>
    %35 = tpu.reciprocal %34 {approx = true} : vector<8x1xf32> -> vector<8x1xf32>
    %36 = vector.extract_strided_slice %4 {offsets = [0, 0], sizes = [16, 32], strides = [1, 1]} : vector<16x128xbf16> to vector<16x32xbf16>
    %37 = arith.truncf %30 : vector<8x16xf32> to vector<8x16xbf16>
    %cst_20 = arith.constant dense<0.000000e+00> : vector<8x32xf32>
    %38 = tpu.matmul %37, %36, %cst_20 {dimension_numbers = #tpu.dot_dimension_numbers<[1], [0], [0], [1], [0, 0, 1, 1], [], []>} : vector<8x16xbf16>, vector<16x32xbf16>, vector<8x32xf32> -> vector<8x32xf32>
    %39 = vector.broadcast %35 : vector<8x1xf32> to vector<8x32xf32>
    %40 = arith.mulf %38, %39 : vector<8x32xf32>
    %41 = vector.extract_strided_slice %10 {offsets = [0, 0], sizes = [1, 32], strides = [1, 1]} : vector<1x128xf32> to vector<1x32xf32>
    %42 = vector.broadcast %41 : vector<1x32xf32> to vector<8x32xf32>
    %43 = arith.addf %40, %42 : vector<8x32xf32>
    %cst_21 = arith.constant 0.000000e+00 : f32
    %44 = vector.broadcast %cst_21 : f32 to vector<8x32xf32>
    %45 = arith.maximumf %43, %44 : vector<8x32xf32>
    %c0_22 = arith.constant 0 : index
    %c0_23 = arith.constant 0 : index
    %46 = vector.load %arg9[%c0_22, %c0_23] : memref<8x128xf32, #tpu.memory_space<vmem>>, vector<8x32xf32>
    tpu.vector_store %arg9[%c0_22, %c0_23], %45 {strides = array<i32>} : memref<8x128xf32, #tpu.memory_space<vmem>>, vector<8x32xf32>,
    %47 = vector.extract_strided_slice %9 {offsets = [0, 1], sizes = [8, 1], strides = [1, 1]} : vector<8x4xf32> to vector<8x1xf32>
    %48 = vector.extract_strided_slice %6 {offsets = [1, 0], sizes = [1, 16], strides = [1, 1]} : vector<4x16xf32> to vector<1x16xf32>
    %49 = vector.broadcast %47 : vector<8x1xf32> to vector<8x16xf32>
    %50 = vector.broadcast %48 : vector<1x16xf32> to vector<8x16xf32>
    %51 = arith.addf %49, %50 : vector<8x16xf32>
    %cst_24 = arith.constant 0.000000e+00 : f32
    %52 = vector.broadcast %cst_24 : f32 to vector<8x16xf32>
    %53 = arith.cmpf ogt, %51, %52 : vector<8x16xf32>
    %cst_25 = arith.constant 2.000000e-01 : f32
    %54 = vector.broadcast %cst_25 : f32 to vector<8x16xf32>
    %55 = arith.mulf %54, %51 : vector<8x16xf32>
    %56 = arith.select %53, %51, %55 : vector<8x16xi1>, vector<8x16xf32>
    %cst_26 = arith.constant 0.000000e+00 : f32
    %57 = vector.broadcast %cst_26 : f32 to vector<8x16xf32>
    %58 = arith.cmpf ogt, %0, %57 : vector<8x16xf32>
    %cst_27 = arith.constant -1.000000e+30 : f32
    %59 = vector.broadcast %cst_27 : f32 to vector<8x16xf32>
    %60 = arith.select %58, %56, %59 : vector<8x16xi1>, vector<8x16xf32>
    %cst_28 = arith.constant dense<0xFF800000> : vector<8xf32>
    %61 = vector.multi_reduction <maximumf>, %60, %cst_28 [1] : vector<8x16xf32> to vector<8xf32>
    %62 = vector.shape_cast %61 : vector<8xf32> to vector<8x1xf32>
    %63 = vector.broadcast %62 : vector<8x1xf32> to vector<8x16xf32>
    %64 = arith.subf %60, %63 : vector<8x16xf32>
    %65 = math.exp %64 : vector<8x16xf32>
    %66 = arith.mulf %65, %0 : vector<8x16xf32>
    %cst_29 = arith.constant dense<0.000000e+00> : vector<8xf32>
    %67 = vector.multi_reduction <add>, %66, %cst_29 [1] : vector<8x16xf32> to vector<8xf32>
    %68 = vector.shape_cast %67 : vector<8xf32> to vector<8x1xf32>
    %cst_30 = arith.constant 1.000000e-30 : f32
    %69 = vector.broadcast %cst_30 : f32 to vector<8x1xf32>
    %70 = arith.maximumf %68, %69 : vector<8x1xf32>
    %71 = tpu.reciprocal %70 {approx = true} : vector<8x1xf32> -> vector<8x1xf32>
    %72 = vector.extract_strided_slice %4 {offsets = [0, 32], sizes = [16, 32], strides = [1, 1]} : vector<16x128xbf16> to vector<16x32xbf16>
    %73 = arith.truncf %66 : vector<8x16xf32> to vector<8x16xbf16>
    %cst_31 = arith.constant dense<0.000000e+00> : vector<8x32xf32>
    %74 = tpu.matmul %73, %72, %cst_31 {dimension_numbers = #tpu.dot_dimension_numbers<[1], [0], [0], [1], [0, 0, 1, 1], [], []>} : vector<8x16xbf16>, vector<16x32xbf16>, vector<8x32xf32> -> vector<8x32xf32>
    %75 = vector.broadcast %71 : vector<8x1xf32> to vector<8x32xf32>
    %76 = arith.mulf %74, %75 : vector<8x32xf32>
    %77 = vector.extract_strided_slice %10 {offsets = [0, 32], sizes = [1, 32], strides = [1, 1]} : vector<1x128xf32> to vector<1x32xf32>
    %78 = vector.broadcast %77 : vector<1x32xf32> to vector<8x32xf32>
    %79 = arith.addf %76, %78 : vector<8x32xf32>
    %cst_32 = arith.constant 0.000000e+00 : f32
    %80 = vector.broadcast %cst_32 : f32 to vector<8x32xf32>
    %81 = arith.maximumf %79, %80 : vector<8x32xf32>
    %c0_33 = arith.constant 0 : index
    %c32 = arith.constant 32 : index
    %82 = vector.load %arg9[%c0_33, %c32] : memref<8x128xf32, #tpu.memory_space<vmem>>, vector<8x32xf32>
    tpu.vector_store %arg9[%c0_33, %c32], %81 {strides = array<i32>} : memref<8x128xf32, #tpu.memory_space<vmem>>, vector<8x32xf32>,
    %83 = vector.extract_strided_slice %9 {offsets = [0, 2], sizes = [8, 1], strides = [1, 1]} : vector<8x4xf32> to vector<8x1xf32>
    %84 = vector.extract_strided_slice %6 {offsets = [2, 0], sizes = [1, 16], strides = [1, 1]} : vector<4x16xf32> to vector<1x16xf32>
    %85 = vector.broadcast %83 : vector<8x1xf32> to vector<8x16xf32>
    %86 = vector.broadcast %84 : vector<1x16xf32> to vector<8x16xf32>
    %87 = arith.addf %85, %86 : vector<8x16xf32>
    %cst_34 = arith.constant 0.000000e+00 : f32
    %88 = vector.broadcast %cst_34 : f32 to vector<8x16xf32>
    %89 = arith.cmpf ogt, %87, %88 : vector<8x16xf32>
    %cst_35 = arith.constant 2.000000e-01 : f32
    %90 = vector.broadcast %cst_35 : f32 to vector<8x16xf32>
    %91 = arith.mulf %90, %87 : vector<8x16xf32>
    %92 = arith.select %89, %87, %91 : vector<8x16xi1>, vector<8x16xf32>
    %cst_36 = arith.constant 0.000000e+00 : f32
    %93 = vector.broadcast %cst_36 : f32 to vector<8x16xf32>
    %94 = arith.cmpf ogt, %0, %93 : vector<8x16xf32>
    %cst_37 = arith.constant -1.000000e+30 : f32
    %95 = vector.broadcast %cst_37 : f32 to vector<8x16xf32>
    %96 = arith.select %94, %92, %95 : vector<8x16xi1>, vector<8x16xf32>
    %cst_38 = arith.constant dense<0xFF800000> : vector<8xf32>
    %97 = vector.multi_reduction <maximumf>, %96, %cst_38 [1] : vector<8x16xf32> to vector<8xf32>
    %98 = vector.shape_cast %97 : vector<8xf32> to vector<8x1xf32>
    %99 = vector.broadcast %98 : vector<8x1xf32> to vector<8x16xf32>
    %100 = arith.subf %96, %99 : vector<8x16xf32>
    %101 = math.exp %100 : vector<8x16xf32>
    %102 = arith.mulf %101, %0 : vector<8x16xf32>
    %cst_39 = arith.constant dense<0.000000e+00> : vector<8xf32>
    %103 = vector.multi_reduction <add>, %102, %cst_39 [1] : vector<8x16xf32> to vector<8xf32>
    %104 = vector.shape_cast %103 : vector<8xf32> to vector<8x1xf32>
    %cst_40 = arith.constant 1.000000e-30 : f32
    %105 = vector.broadcast %cst_40 : f32 to vector<8x1xf32>
    %106 = arith.maximumf %104, %105 : vector<8x1xf32>
    %107 = tpu.reciprocal %106 {approx = true} : vector<8x1xf32> -> vector<8x1xf32>
    %108 = vector.extract_strided_slice %4 {offsets = [0, 64], sizes = [16, 32], strides = [1, 1]} : vector<16x128xbf16> to vector<16x32xbf16>
    %109 = arith.truncf %102 : vector<8x16xf32> to vector<8x16xbf16>
    %cst_41 = arith.constant dense<0.000000e+00> : vector<8x32xf32>
    %110 = tpu.matmul %109, %108, %cst_41 {dimension_numbers = #tpu.dot_dimension_numbers<[1], [0], [0], [1], [0, 0, 1, 1], [], []>} : vector<8x16xbf16>, vector<16x32xbf16>, vector<8x32xf32> -> vector<8x32xf32>
    %111 = vector.broadcast %107 : vector<8x1xf32> to vector<8x32xf32>
    %112 = arith.mulf %110, %111 : vector<8x32xf32>
    %113 = vector.extract_strided_slice %10 {offsets = [0, 64], sizes = [1, 32], strides = [1, 1]} : vector<1x128xf32> to vector<1x32xf32>
    %114 = vector.broadcast %113 : vector<1x32xf32> to vector<8x32xf32>
    %115 = arith.addf %112, %114 : vector<8x32xf32>
    %cst_42 = arith.constant 0.000000e+00 : f32
    %116 = vector.broadcast %cst_42 : f32 to vector<8x32xf32>
    %117 = arith.maximumf %115, %116 : vector<8x32xf32>
    %c0_43 = arith.constant 0 : index
    %c64 = arith.constant 64 : index
    %118 = vector.load %arg9[%c0_43, %c64] : memref<8x128xf32, #tpu.memory_space<vmem>>, vector<8x32xf32>
    tpu.vector_store %arg9[%c0_43, %c64], %117 {strides = array<i32>} : memref<8x128xf32, #tpu.memory_space<vmem>>, vector<8x32xf32>,
    %119 = vector.extract_strided_slice %9 {offsets = [0, 3], sizes = [8, 1], strides = [1, 1]} : vector<8x4xf32> to vector<8x1xf32>
    %120 = vector.extract_strided_slice %6 {offsets = [3, 0], sizes = [1, 16], strides = [1, 1]} : vector<4x16xf32> to vector<1x16xf32>
    %121 = vector.broadcast %119 : vector<8x1xf32> to vector<8x16xf32>
    %122 = vector.broadcast %120 : vector<1x16xf32> to vector<8x16xf32>
    %123 = arith.addf %121, %122 : vector<8x16xf32>
    %cst_44 = arith.constant 0.000000e+00 : f32
    %124 = vector.broadcast %cst_44 : f32 to vector<8x16xf32>
    %125 = arith.cmpf ogt, %123, %124 : vector<8x16xf32>
    %cst_45 = arith.constant 2.000000e-01 : f32
    %126 = vector.broadcast %cst_45 : f32 to vector<8x16xf32>
    %127 = arith.mulf %126, %123 : vector<8x16xf32>
    %128 = arith.select %125, %123, %127 : vector<8x16xi1>, vector<8x16xf32>
    %cst_46 = arith.constant 0.000000e+00 : f32
    %129 = vector.broadcast %cst_46 : f32 to vector<8x16xf32>
    %130 = arith.cmpf ogt, %0, %129 : vector<8x16xf32>
    %cst_47 = arith.constant -1.000000e+30 : f32
    %131 = vector.broadcast %cst_47 : f32 to vector<8x16xf32>
    %132 = arith.select %130, %128, %131 : vector<8x16xi1>, vector<8x16xf32>
    %cst_48 = arith.constant dense<0xFF800000> : vector<8xf32>
    %133 = vector.multi_reduction <maximumf>, %132, %cst_48 [1] : vector<8x16xf32> to vector<8xf32>
    %134 = vector.shape_cast %133 : vector<8xf32> to vector<8x1xf32>
    %135 = vector.broadcast %134 : vector<8x1xf32> to vector<8x16xf32>
    %136 = arith.subf %132, %135 : vector<8x16xf32>
    %137 = math.exp %136 : vector<8x16xf32>
    %138 = arith.mulf %137, %0 : vector<8x16xf32>
    %cst_49 = arith.constant dense<0.000000e+00> : vector<8xf32>
    %139 = vector.multi_reduction <add>, %138, %cst_49 [1] : vector<8x16xf32> to vector<8xf32>
    %140 = vector.shape_cast %139 : vector<8xf32> to vector<8x1xf32>
    %cst_50 = arith.constant 1.000000e-30 : f32
    %141 = vector.broadcast %cst_50 : f32 to vector<8x1xf32>
    %142 = arith.maximumf %140, %141 : vector<8x1xf32>
    %143 = tpu.reciprocal %142 {approx = true} : vector<8x1xf32> -> vector<8x1xf32>
    %144 = vector.extract_strided_slice %4 {offsets = [0, 96], sizes = [16, 32], strides = [1, 1]} : vector<16x128xbf16> to vector<16x32xbf16>
    %145 = arith.truncf %138 : vector<8x16xf32> to vector<8x16xbf16>
    %cst_51 = arith.constant dense<0.000000e+00> : vector<8x32xf32>
    %146 = tpu.matmul %145, %144, %cst_51 {dimension_numbers = #tpu.dot_dimension_numbers<[1], [0], [0], [1], [0, 0, 1, 1], [], []>} : vector<8x16xbf16>, vector<16x32xbf16>, vector<8x32xf32> -> vector<8x32xf32>
    %147 = vector.broadcast %143 : vector<8x1xf32> to vector<8x32xf32>
    %148 = arith.mulf %146, %147 : vector<8x32xf32>
    %149 = vector.extract_strided_slice %10 {offsets = [0, 96], sizes = [1, 32], strides = [1, 1]} : vector<1x128xf32> to vector<1x32xf32>
    %150 = vector.broadcast %149 : vector<1x32xf32> to vector<8x32xf32>
    %151 = arith.addf %148, %150 : vector<8x32xf32>
    %cst_52 = arith.constant 0.000000e+00 : f32
    %152 = vector.broadcast %cst_52 : f32 to vector<8x32xf32>
    %153 = arith.maximumf %151, %152 : vector<8x32xf32>
    %c0_53 = arith.constant 0 : index
    %c96 = arith.constant 96 : index
    %154 = vector.load %arg9[%c0_53, %c96] : memref<8x128xf32, #tpu.memory_space<vmem>>, vector<8x32xf32>
    tpu.vector_store %arg9[%c0_53, %c96], %153 {strides = array<i32>} : memref<8x128xf32, #tpu.memory_space<vmem>>, vector<8x32xf32>,
    %c0_54 = arith.constant 0 : index
    %c0_55 = arith.constant 0 : index
    %155 = vector.load %arg9[%c0_54, %c0_55] : memref<8x128xf32, #tpu.memory_space<vmem>>, vector<8x128xf32>
    %156 = arith.truncf %155 : vector<8x128xf32> to vector<8x128xbf16>
    %c0_56 = arith.constant 0 : index
    %c0_57 = arith.constant 0 : index
    %157 = vector.load %arg6[%c0_56, %c0_57] : memref<128x128xbf16, #tpu.memory_space<vmem>>, vector<128x128xbf16>
    %cst_58 = arith.constant dense<0.000000e+00> : vector<8x128xf32>
    %158 = tpu.matmul %156, %157, %cst_58 {dimension_numbers = #tpu.dot_dimension_numbers<[1], [0], [0], [1], [0, 0, 1, 1], [], []>} : vector<8x128xbf16>, vector<128x128xbf16>, vector<8x128xf32> -> vector<8x128xf32>
    %c0_59 = arith.constant 0 : index
    %c0_60 = arith.constant 0 : index
    %159 = vector.load %arg7[%c0_59, %c0_60] : memref<1x128xf32, #tpu.memory_space<vmem>>, vector<1x128xf32>
    %160 = vector.broadcast %159 : vector<1x128xf32> to vector<8x128xf32>
    %161 = arith.addf %158, %160 : vector<8x128xf32>
    %162 = arith.mulf %161, %161 : vector<8x128xf32>
    %cst_61 = arith.constant dense<0.000000e+00> : vector<8xf32>
    %163 = vector.multi_reduction <add>, %162, %cst_61 [1] : vector<8x128xf32> to vector<8xf32>
    %164 = vector.shape_cast %163 : vector<8xf32> to vector<8x1xf32>
    %cst_62 = arith.constant dense<0.000000e+00> : vector<1xf32>
    %165 = vector.multi_reduction <add>, %164, %cst_62 [0] : vector<8x1xf32> to vector<1xf32>
    %166 = vector.shape_cast %165 : vector<1xf32> to vector<1x1xf32>
    %167 = math.rsqrt %166 : vector<1x1xf32>
    %168 = vector.broadcast %167 : vector<1x1xf32> to vector<8x128xf32>
    %169 = arith.mulf %161, %168 : vector<8x128xf32>
    %c0_63 = arith.constant 0 : index
    %c0_64 = arith.constant 0 : index
    %170 = vector.load %arg8[%c0_63, %c0_64] : memref<8x128xf32, #tpu.memory_space<vmem>>, vector<8x128xf32>
    tpu.vector_store %arg8[%c0_63, %c0_64], %169 {strides = array<i32>} : memref<8x128xf32, #tpu.memory_space<vmem>>, vector<8x128xf32>,
    return
  }
}

</mosaic_0001>

<bundles_post_ra>
// kernel: tpu_custom_call.1
= control target key start
LH: loop header
LB: loop body
LE: loop exit
PB: predicated region body
PF: predicated region fallthrough
CT: control target
= control target key end

     0   :  { %vm55_vm0 = vcmask 261120   ;;  %s782_s0 = inlined_call_operand.vmem [shape: bf16[16,32], index: 0, kind: input, shape index: {}]   ;;  %s783_s1 = inlined_call_operand.vmem [shape: bf16[32,128], index: 1, kind: input, shape index: {}]   ;;  %s784_s2 = inlined_call_operand.vmem [shape: f32[4,128], index: 2, kind: input, shape index: {}]   ;;  %s785_s3 = inlined_call_operand.vmem [shape: f32[128,4], index: 3, kind: input, shape index: {}]   ;;  %s786_s4 = inlined_call_operand.vmem [shape: f32[1,128], index: 4, kind: input, shape index: {}]   ;;  %s787_s5 = inlined_call_operand.vmem [shape: f32[8,16], index: 5, kind: input, shape index: {}]   ;;  %s788_s6 = inlined_call_operand.vmem [shape: bf16[128,128], index: 6, kind: input, shape index: {}]   ;;  %s789_s7 = inlined_call_operand.vmem [shape: f32[1,128], index: 7, kind: input, shape index: {}]   ;;  %s790_s8 = inlined_call_operand.hbm [shape: f32[8,128], index: 8, kind: output, shape index: {}]  }
   0x1   :  { %v521_v0 = vld [vmem:[%s783_s1 + $0x8] sm:$0xff]  ;;  %v111_v1 = vld [vmem:[%s785_s3 + $0x78] sm:$0xff]  ;;  %v110_v2 = vld [vmem:[%s785_s3 + $0x70] sm:$0xff] }
   0x2   :  { %65 = vmatpush.bf16.msra.mxu0 %v521_v0  ;;  %v520_v3 = vld [vmem:[%s783_s1] sm:$0xff]  ;;  %112 = vmatpush.msra.mxu2 %v111_v1  ;;  %v109_v4 = vld [vmem:[%s785_s3 + $0x68] sm:$0xff] }
   0x3   :  { %v519_v5 = vld [vmem:[%s782_s0] sm:$0xff] }
   0x4   :  { %113 = vmatpush.msra.mxu2 %v110_v2  ;;  %v108_v6 = vld [vmem:[%s785_s3 + $0x60] sm:$0xff] }
   0x6   :  { %66 = vmatpush.bf16.msra.mxu0 %v520_v3  ;;  %114 = vmatpush.msra.mxu2 %v109_v4 }
   0x7   :  { %13 = vsyncpa [#allocation4], 0  ;;  %v107_v7 = vld [vmem:[%s785_s3 + $0x58] sm:$0xff]  ;;  %v106_v8 = vld [vmem:[%s785_s3 + $0x50] sm:$0xff]  ;;  %v589_v19 = vmov 1   ;;  %v590_v20 = vmov 0  }
   0x8   :  { %115 = vmatpush.msra.mxu2 %v108_v6  ;;  %v105_v9 = vld [vmem:[%s785_s3 + $0x48] sm:$0xff]  ;;  %v104_v10 = vld [vmem:[%s785_s3 + $0x40] sm:$0xff]  ;;  %v103_v11 = vld [vmem:[%s785_s3 + $0x38] sm:$0xff]  ;;  %540 = vset.pattern.permute.xlu1 %v589_v19  ;;  %v591_v30 = vmov 3   ;;  %v592_v31 = vmov 2   ;;  %s594_s20 = smov 32  }
   0x9   :  { %482 = vmatmul.msk.bf16.vlgmr.msra.gmra.mxu0 %vm55_vm0, %v519_v5  ;;  %v102_v12 = vld [vmem:[%s785_s3 + $0x30] sm:$0xff]  ;;  %v101_v13 = vld [vmem:[%s785_s3 + $0x28] sm:$0xff]  ;;  %v100_v14 = vld [vmem:[%s785_s3 + $0x20] sm:$0xff]  ;;  %538 = vset.pattern.permute.xlu0 %v590_v20  ;;  %vm145_vm4 = vcmask 130048   ;;  %vm240_vm7 = vcmask 523520   ;;  %vm294_vm8 = vcmask 785920  }
   0xa   :  { %116 = vmatpush.msra.mxu2 %v107_v7  ;;  %v99_v15 = vld [vmem:[%s785_s3 + $0x18] sm:$0xff]  ;;  %v98_v16 = vld [vmem:[%s785_s3 + $0x10] sm:$0xff]  ;;  %v97_v17 = vld [vmem:[%s785_s3 + $0x8] sm:$0xff]  ;;  %vm348_vm9 = vcmask 1048320   ;;  %s461_s1 = sshll.u32 %s790_s8, 4  ;;  %s462_s1 = int_to_ptr.hbm [resolvable:$true] %s461_s1 }
   0xb   :  { %v96_v18 = vld [vmem:[%s785_s3] sm:$0xff]  ;;  %s593_s3 = smov 64  }
   0xc   :  { %117 = vmatpush.msra.mxu2 %v106_v8  ;;  %v75_v28 = vld [vmem:[%s784_s2] sm:$0xf] }
   0xd   :  { %v713_v35 = vld [vmem:[%s787_s5] sm:$0xff]  ;;  %s595_s5 = smov 96  }
   0xe   :  { %118 = vmatpush.msra.mxu2 %v105_v9  ;;  %vm143_vm1 = vcmp.gt.f32.partialorder %v713_v35, 0.0 }
  0x10   :  { %119 = vmatpush.msra.mxu2 %v104_v10 }
  0x12   :  { %120 = vmatpush.msra.mxu2 %v103_v11 }
  0x14   :  { %121 = vmatpush.msra.mxu2 %v102_v12 }
  0x16   :  { %122 = vmatpush.msra.mxu2 %v101_v13 }
  0x18   :  { %123 = vmatpush.msra.mxu2 %v100_v14 }
  0x1a   :  { %124 = vmatpush.msra.mxu2 %v99_v15 }
  0x1c   :  { %125 = vmatpush.msra.mxu2 %v98_v16 }
  0x1e   :  { %126 = vmatpush.msra.mxu2 %v97_v17 }
  0x20   :  { %127 = vmatpush.msra.mxu2 %v96_v18 }
  0x86   :  { %v68_v21 = vpop.f32.mrf.mxu0 }
  0x87   :  { %128 = vmatmul.f32.vlgmr.msra.gmra.mxu2 %v68_v21  ;;  %v73_v22 = vpack.c.bf16 %v68_v21, %v68_v21 }
  0x89   :  { %v161_v25 = vunpack.c.l.b16 %v73_v22 }
  0x8e   :  { %v70_v23 = vpop.f32.mrf.mxu0 }
  0x8f   :  { %v74_v24 = vpack.c.bf16 %v70_v23, %v70_v23  ;;  %90 = vmatpush.xpose.msra.mxu3 %v70_v23 }
  0x91   :  { %v162_v26 = vunpack.c.l.b16 %v74_v24 }
  0x93   :  { %v700_v27 = vpack.c.b16 %v162_v26, %v161_v25  ;;  %91 = vmatpush.xpose.msra.mxu3 %v68_v21 }
  0x96   :  { %92 = vmatmul.f32.vlgmr.msra.gmra.mxu3 %v75_v28  ;;  %v543_v28 = vld [vmem:[%s786_s4] ss:$0 sm:$0xff] }
  0x97   :  { %175 = vmatpush.bf16.msrb.mxu3 %v700_v27 }
 0x10a   :  { %v129_v29 = vpop.f32.mrf.mxu2 }
 0x10b   :  { %189 = vperm.xlu1 %540, %v129_v29   ;;  %135 = vperm.xlu0 %538, %v129_v29  }
 0x113   :  { %541 = vset.pattern.permute.xlu1 %v591_v30  ;;  %539 = vset.pattern.permute.xlu0 %v592_v31 }
 0x114   :  { %297 = vperm.xlu1 %541, %v129_v29   ;;  %243 = vperm.xlu0 %539, %v129_v29  }
 0x119   :  { %v93_v32 = vpop.f32.mrf.mxu3 }
 0x11a   :  { %v192_v33 = vperm.slane %v93_v32, 1  ;;  %v138_v34 = vperm.slane %v93_v32, 0  ;;  %v300_v48 = vperm.slane %v93_v32, 3  ;;  %v246_v49 = vperm.slane %v93_v32, 2 }
 0x11c   :  { %265 = vrot.lane.b32.xlu0 %v700_v27, %s593_s3 }
 0x11d   :  { %542 = vset.pattern.permute.xlu0 %v591_v30 }
 0x124   :  { %319 = vrot.lane.b32.xlu0 %v700_v27, %s594_s20 }
 0x17d   :  { %v190_v36 = vpop.permute.xlu1 %189  ;;  %v136_v37 = vpop.permute.xlu0 %135 }
 0x17e   :  { %v193_v38 = vadd.f32 %v192_v33, %v190_v36  ;;  %v139_v39 = vadd.f32 %v138_v34, %v136_v37 }
 0x180   :  { %v195_v40 = vmul.f32 0.2, %v193_v38  ;;  %v141_v41 = vmul.f32 0.2, %v139_v39  ;;  %vm194_vm2 = vcmp.gt.f32.partialorder %v193_v38, 0.0  ;;  %vm140_vm3 = vcmp.gt.f32.partialorder %v139_v39, 0.0 }
 0x182   :  { %v196_v42 = vsel %vm194_vm2, %v193_v38, %v195_v40  ;;  %v142_v43 = vsel %vm140_vm3, %v139_v39, %v141_v41 }
 0x183   :  { %v197_v44 = vsel %vm143_vm1, %v196_v42, -1e+30  ;;  %v144_v45 = vsel %vm143_vm1, %v142_v43, -1e+30 }
 0x184   :  { %v198_v46 = vsel %vm145_vm4, %v197_v44, -inf  ;;  %v146_v47 = vsel %vm145_vm4, %v144_v45, -inf }
 0x185   :  { %199 = vmax.xlane.f32.xlu1 %v198_v46  ;;  %147 = vmax.xlane.f32.xlu2 %v146_v47 }
 0x186   :  { %v298_v50 = vpop.permute.xlu1 %297  ;;  %v244_v51 = vpop.permute.xlu0 %243 }
 0x187   :  { %v301_v52 = vadd.f32 %v300_v48, %v298_v50  ;;  %v247_v53 = vadd.f32 %v246_v49, %v244_v51 }
 0x189   :  { %v249_v54 = vmul.f32 0.2, %v247_v53  ;;  %vm248_vm5 = vcmp.gt.f32.partialorder %v247_v53, 0.0  ;;  %v303_v55 = vmul.f32 0.2, %v301_v52  ;;  %vm302_vm6 = vcmp.gt.f32.partialorder %v301_v52, 0.0 }
 0x18b   :  { %v250_v56 = vsel %vm248_vm5, %v247_v53, %v249_v54  ;;  %v304_v60 = vsel %vm302_vm6, %v301_v52, %v303_v55 }
 0x18c   :  { %v251_v57 = vsel %vm143_vm1, %v250_v56, -1e+30  ;;  %v305_v61 = vsel %vm143_vm1, %v304_v60, -1e+30 }
 0x18d   :  { %v252_v58 = vsel %vm145_vm4, %v251_v57, -inf  ;;  %v306_v62 = vsel %vm145_vm4, %v305_v61, -inf }
 0x18e   :  { %v266_v59 = vpop.permute.xlu0 %265  ;;  %253 = vmax.xlane.f32.xlu2 %v252_v58 }
 0x18f   :  { %278 = vmatpush.bf16.msra.mxu3 %v266_v59 }
 0x196   :  { %v320_v63 = vpop.permute.xlu0 %319  ;;  %307 = vmax.xlane.f32.xlu2 %v306_v62  ;;  %v529_v62 = vld [vmem:[%s788_s6 + $0x38] sm:$0xff] }
 0x197   :  { %332 = vmatpush.bf16.msrb.mxu0 %v320_v63 }
 0x1ae   :  { %211 = vrot.lane.b32.xlu2 %v700_v27, %s595_s5 }
 0x1f8   :  { %v200_v0 = vpop.xlane.xlu1 %199  ;;  %v148_v1 = vpop.xlane.xlu2 %147 }
 0x1f9   :  { %v201_v2 = vsub.f32 %v197_v44, %v200_v0  ;;  %v149_v3 = vsub.f32 %v144_v45, %v148_v1  ;;  %v528_v0 = vld [vmem:[%s788_s6 + $0x30] sm:$0xff] }
 0x1fb   :  { %v202_v4 = vmul.f32 1.442695, %v201_v2  ;;  %v150_v5 = vmul.f32 1.442695, %v149_v3  ;;  %v527_v3 = vld [vmem:[%s788_s6 + $0x28] sm:$0xff] }
 0x1fd   :  { %545 = vpow2.f32 %v202_v4  ;;  %v526_v4 = vld [vmem:[%s788_s6 + $0x20] sm:$0xff] }
 0x1fe   :  { %547 = vpow2.f32 %v150_v5  ;;  %v525_v5 = vld [vmem:[%s788_s6 + $0x18] sm:$0xff] }
 0x201   :  { %v254_v6 = vpop.xlane.xlu2 %253 }
 0x202   :  { %v255_v7 = vsub.f32 %v251_v57, %v254_v6  ;;  %v524_v6 = vld [vmem:[%s788_s6 + $0x10] sm:$0xff] }
 0x203   :  { %v546_v8 = vpop.eup %545 }
 0x204   :  { %v548_v9 = vpop.eup %547  ;;  %v256_v10 = vmul.f32 1.442695, %v255_v7  ;;  %v204_v11 = vmul.f32 %v546_v8, %v713_v35  ;;  %v523_v7 = vld [vmem:[%s788_s6 + $0x8] sm:$0xff]  ;;  %v522_v8 = vld [vmem:[%s788_s6] sm:$0xff]  ;;  %s596_s6 = smov [#allocation3]  }
 0x205   :  { %v152_v12 = vmul.f32 %v548_v9, %v713_v35 }
 0x206   :  { %549 = vpow2.f32 %v256_v10  ;;  %v205_v13 = vsel %vm145_vm4, %v204_v11, 0.0  ;;  %v210_v22 = vpack.c.bf16 %v204_v11, %v204_v11 }
 0x207   :  { %206 = vadd.xlane.f32.xlu0 %v205_v13  ;;  %v158_v14 = vpack.c.bf16 %v152_v12, %v152_v12  ;;  %v153_v29 = vsel %vm145_vm4, %v152_v12, 0.0 }
 0x209   :  { %483 = vmatmul.msk.bf16.vlgmr.msrb.gmra.mxu3 %vm145_vm4, %v158_v14  ;;  %v308_v15 = vpop.xlane.xlu2 %307  ;;  %v544_v14 = vld [vmem:[%s789_s7] ss:$0 sm:$0xff]  ;;  %s459_s7 = sshll.u32 %s596_s6, 4  ;;  %s460_s7 = int_to_ptr.vmem [resolvable:$true] %s459_s7 }
 0x20a   :  { %v309_v16 = vsub.f32 %v305_v61, %v308_v15 }
 0x20c   :  { %v550_v17 = vpop.eup %549  ;;  %v310_v18 = vmul.f32 1.442695, %v309_v16 }
 0x20d   :  { %v258_v19 = vmul.f32 %v550_v17, %v713_v35 }
 0x20e   :  { %551 = vpow2.f32 %v310_v18 }
 0x20f   :  { %v259_v20 = vsel %vm145_vm4, %v258_v19, 0.0  ;;  %v264_v25 = vpack.c.bf16 %v258_v19, %v258_v19 }
 0x210   :  { %260 = vadd.xlane.f32.xlu2 %v259_v20 }
 0x211   :  { %v212_v21 = vpop.permute.xlu2 %211 }
 0x212   :  { %224 = vmatpush.bf16.msra.mxu1 %v212_v21 }
 0x214   :  { %v552_v23 = vpop.eup %551 }
 0x215   :  { %484 = vmatmul.msk.bf16.vlgmr.msra.gmra.mxu1 %vm145_vm4, %v210_v22  ;;  %v312_v24 = vmul.f32 %v552_v23, %v713_v35 }
 0x216   :  { %420 = vmatpush.bf16.msrb.mxu1 %v529_v62 }
 0x217   :  { %v313_v26 = vsel %vm145_vm4, %v312_v24, 0.0  ;;  %v318_v27 = vpack.c.bf16 %v312_v24, %v312_v24 }
 0x218   :  { %314 = vadd.xlane.f32.xlu1 %v313_v26 }
 0x219   :  { %485 = vmatmul.msk.bf16.vlgmr.msra.gmra.mxu3 %vm145_vm4, %v264_v25  ;;  %486 = vmatmul.msk.bf16.vlgmr.msrb.gmra.mxu0 %vm145_vm4, %v318_v27 }
 0x21a   :  { %421 = vmatpush.bf16.msrb.mxu1 %v528_v0 }
 0x21b   :  { %285 = vrot.lane.b32.xlu0 %v543_v28, %s593_s3 }
 0x21e   :  { %422 = vmatpush.bf16.msrb.mxu1 %v527_v3 }
 0x222   :  { %423 = vmatpush.bf16.msrb.mxu1 %v526_v4 }
 0x226   :  { %424 = vmatpush.bf16.msrb.mxu1 %v525_v5 }
 0x228   :  { %339 = vrot.lane.b32.xlu2 %v543_v28, %s594_s20 }
 0x22a   :  { %425 = vmatpush.bf16.msrb.mxu1 %v524_v6 }
 0x22e   :  { %426 = vmatpush.bf16.msrb.mxu1 %v523_v7 }
 0x231   :  { %231 = vrot.lane.b32.xlu1 %v543_v28, %s595_s5 }
 0x232   :  { %427 = vmatpush.bf16.msrb.mxu1 %v522_v8 }
 0x25b   :  { %154 = vadd.xlane.f32.xlu1 %v153_v29 }
 0x27a   :  { %v207_v35 = vpop.xlane.xlu0 %206 }
 0x27b   :  { %v208_v40 = vmax.f32 %v207_v35, 1e-30 }
 0x283   :  { %v261_v33 = vpop.xlane.xlu2 %260 }
 0x284   :  { %v262_v44 = vmax.f32 %v261_v33, 1e-30 }
 0x28b   :  { %v315_v30 = vpop.xlane.xlu1 %314  ;;  %v340_v39 = vpop.permute.xlu2 %339 }
 0x28c   :  { %v177_v31 = vpop.f32.mrf.mxu3  ;;  %v316_v32 = vmax.f32 %v315_v30, 1e-30 }
 0x28d   :  { %v286_v56 = vpop.permute.xlu0 %285 }
 0x28e   :  { %553 = vrcp.f32 %v316_v32 }
 0x28f   :  { %555 = vrcp.f32 %v208_v40 }
 0x290   :  { %557 = vrcp.f32 %v262_v44 }
 0x292   :  { %v226_v34 = vpop.f32.mrf.mxu1 }
 0x294   :  { %v179_v36 = vpop.f32.mrf.mxu3  ;;  %v554_v37 = vpop.eup %553 }
 0x295   :  { %v556_v48 = vpop.eup %555 }
 0x296   :  { %v334_v38 = vpop.f32.mrf.mxu0  ;;  %v230_v49 = vmul.f32 %v556_v48, %v226_v34  ;;  %v558_v53 = vpop.eup %557 }
 0x297   :  { %v338_v41 = vmul.f32 %v554_v37, %v334_v38 }
 0x299   :  { %v342_v42 = vadd.f32 %v340_v39, %v338_v41 }
 0x29a   :  { %v228_v43 = vpop.f32.mrf.mxu1 }
 0x29b   :  { %v343_v45 = vmax.f32 %v342_v42, 0.0 }
 0x29c   :  { %v280_v46 = vpop.f32.mrf.mxu3 }
 0x29d   :  { %345 = vrot.lane.b32.xlu2 %v343_v45, %s595_s5  ;;  %v284_v54 = vmul.f32 %v558_v53, %v280_v46 }
 0x29e   :  { %v336_v47 = vpop.f32.mrf.mxu0 }
 0x29f   :  { %v288_v57 = vadd.f32 %v286_v56, %v284_v54 }
 0x2a1   :  { %v289_v58 = vmax.f32 %v288_v57, 0.0 }
 0x2a3   :  { %v232_v50 = vpop.permute.xlu1 %231 }
 0x2a4   :  { %v282_v51 = vpop.f32.mrf.mxu3  ;;  %v234_v52 = vadd.f32 %v232_v50, %v230_v49 }
 0x2a6   :  { %v235_v55 = vmax.f32 %v234_v52, 0.0 }
 0x2a8   :  { %237 = vrot.lane.b32.xlu0 %v235_v55, %s594_s20 }
 0x2b0   :  { %291 = vrot.lane.b32.xlu0 %v289_v58, %s593_s3 }
 0x2ce   :  { %v155_v59 = vpop.xlane.xlu1 %154 }
 0x2cf   :  { %v156_v60 = vmax.f32 %v155_v59, 1e-30 }
 0x2d1   :  { %559 = vrcp.f32 %v156_v60 }
 0x2d7   :  { %v560_v61 = vpop.eup %559 }
 0x2d8   :  { %v181_v63 = vmul.f32 %v560_v61, %v177_v31 }
 0x2da   :  { %v185_v1 = vadd.f32 %v543_v28, %v181_v63 }
 0x2dc   :  { %v186_v2 = vmax.f32 %v185_v1, 0.0 }
 0x2de   :  { %187 = vst.msk [vmem:[#allocation2] sm:$0xff] %vm55_vm0, %v186_v2 }
 0x2f7   :  { %v346_v11 = vpop.permute.xlu2 %345 }
 0x31a   :  { %v238_v9 = vpop.permute.xlu0 %237 }
 0x31b   :  { %241 = vst.msk [vmem:[#allocation2] sm:$0xff] %vm240_vm7, %v238_v9 }
 0x322   :  { %v292_v10 = vpop.permute.xlu0 %291 }
 0x323   :  { %295 = vst.msk [vmem:[#allocation2] sm:$0xff] %vm294_vm8, %v292_v10 }
 0x324   :  { %349 = vst.msk [vmem:[#allocation2] sm:$0xff] %vm348_vm9, %v346_v11 }
 0x32b   :  { %v350_v12 = vld [vmem:[#allocation2] sm:$0xff] }
 0x32c   :  { %v351_v13 = vpack.c.bf16 %v350_v12, %v350_v12 }
 0x32e   :  { %428 = vmatmul.bf16.vlgmr.msrb.gmra.mxu1 %v351_v13 }
 0x3ab   :  { %v429_v15 = vpop.f32.mrf.mxu1 }
 0x3ac   :  { %v430_v16 = vadd.f32 %v544_v14, %v429_v15 }
 0x3ae   :  { %v433_v17 = vmul.f32 %v430_v16, %v430_v16 }
 0x3b0   :  { %434 = vadd.xlane.f32.xlu0 %v433_v17 }
 0x3b3   :  { %v431_v18 = vpop.f32.mrf.mxu1 }
 0x423   :  { %v435_v19 = vpop.xlane.xlu0 %434 }
 0x424   :  { %v436_v20 = vrot.slane %v435_v19, 4 }
 0x426   :  { %v437_v21 = vadd.f32 %v436_v20, %v435_v19 }
 0x428   :  { %v438_v22 = vrot.slane %v437_v21, 2 }
 0x42a   :  { %v439_v23 = vadd.f32 %v438_v22, %v437_v21 }
 0x42c   :  { %v440_v24 = vrot.slane %v439_v23, 1 }
 0x42e   :  { %v441_v25 = vadd.f32 %v440_v24, %v439_v23 }
 0x430   :  { %561 = vrsqrt.f32 %v441_v25  ;;  %vm448_vm11 = vweird.f32 %v441_v25 }
 0x436   :  { %v562_v26 = vpop.eup %561 }
 0x437   :  { %v443_v27 = vmul.f32 %v562_v26, %v441_v25  ;;  %vm449_vm10 = vweird.f32 %v562_v26 }
 0x438   :  { %vm450_vm12 = vmor %vm448_vm11, %vm449_vm10 }
 0x439   :  { %v444_v28 = vmul.f32 %v562_v26, %v443_v27 }
 0x43b   :  { %v445_v29 = vmul.f32 0.5, %v444_v28 }
 0x43d   :  { %v446_v30 = vsub.f32 1.5, %v445_v29 }
 0x43f   :  { %v447_v31 = vmul.f32 %v562_v26, %v446_v30 }
 0x441   :  { %v451_v32 = vsel %vm450_vm12, %v562_v26, %v447_v31 }
 0x442   :  { %v452_v33 = vmul.f32 %v451_v32, %v430_v16 }
 0x444   :  { %453 = vst [vmem:[#allocation3] sm:$0xff] %v452_v33 }
 0x445   :  { %464 = dma.vmem_to_hbm [thread:$0]  %s460_s7, 128, %s462_s1, [#allocation4]  }
 0x446   :  { %587 = dma.done.wait [#allocation4], 128  }
 0x447   :  { %588 = vsyncadd [#allocation4], 4294967168 }
 0x448   :  { %469 = vsyncpa [#allocation4], 1 }

</bundles_post_ra>
